<compile_context>
chip_gen: v7x
topology: tpu7x:2x2x1
jax: 0.10.0
libtpu: 0.0.40
codegen_flags: <defaults>
</compile_context>

<pallas_src>
import jax
import jax.numpy as jnp
from jax.experimental import pallas as pl
from jax.experimental.pallas import tpu as pltpu


def _round_up(x, m):
    return ((x + m - 1) // m) * m


def _spectral_kernel(xr_ref, xi_ref, w_ref, or_ref, oi_ref):
    """One grid step = mode_block Fourier modes.

    xr_ref, xi_ref: (MB, B_pad, Cin_p)        bf16, Re/Im of x_ft
    w_ref:          (MB, Cin_p, 2*Cout_p)     bf16, [Wr | Wi] along lanes
    or_ref, oi_ref: (MB, B_pad, Cout_p)       f32,  Re/Im of out_ft
    """
    cout_p = or_ref.shape[-1]
    # t1 = [xr@Wr | xr@Wi],  t2 = [xi@Wr | xi@Wi]   (f32 accumulation on MXU)
    t1 = jnp.einsum("mbc,mcd->mbd", xr_ref[...], w_ref[...],
                    preferred_element_type=jnp.float32)
    t2 = jnp.einsum("mbc,mcd->mbd", xi_ref[...], w_ref[...],
                    preferred_element_type=jnp.float32)
    # Complex multiply: Re = xr*Wr - xi*Wi ; Im = xr*Wi + xi*Wr
    # (cout_p is a multiple of 128 -> lane-block slices, cheap VPU recombine.)
    or_ref[...] = t1[..., :cout_p] - t2[..., cout_p:]
    oi_ref[...] = t1[..., cout_p:] + t2[..., :cout_p]


def spectral_mul(xr, xi, w_fused, mode_block):
    """xr, xi:   (modes_pad, B_pad, Cin_p)      bf16
       w_fused:  (modes_pad, Cin_p, 2*Cout_p)   bf16  ([Wr|Wi] per mode)
       returns (out_re, out_im): (modes_pad, B_pad, Cout_p) f32 each."""
    modes_pad, b_pad, cin_p = xr.shape
    two_cout = w_fused.shape[-1]
    cout_p = two_cout // 2
    assert modes_pad % mode_block == 0
    grid = modes_pad // mode_block

    # Per-step VMEM working set (one buffer); pipeline double-buffers it.
    step_bytes = mode_block * (
        2 * b_pad * cin_p * xr.dtype.itemsize            # xr + xi tiles
        + cin_p * two_cout * w_fused.dtype.itemsize       # streamed weight tile
        + 2 * b_pad * cout_p * 4                          # out_re + out_im (f32)
    )
    vmem_limit = int(min(64 << 20, max(32 << 20, 2 * step_bytes + (4 << 20))))

    return pl.pallas_call(
        _spectral_kernel,
        out_shape=(
            jax.ShapeDtypeStruct((modes_pad, b_pad, cout_p), jnp.float32),
            jax.ShapeDtypeStruct((modes_pad, b_pad, cout_p), jnp.float32),
        ),
        grid_spec=pltpu.PrefetchScalarGridSpec(
            num_scalar_prefetch=0,
            grid=(grid,),
            in_specs=[
                pl.BlockSpec((mode_block, b_pad, cin_p), lambda i: (i, 0, 0)),
                pl.BlockSpec((mode_block, b_pad, cin_p), lambda i: (i, 0, 0)),
                # Weights streamed per mode-block (used once -> no residency).
                pl.BlockSpec((mode_block, cin_p, two_cout), lambda i: (i, 0, 0)),
            ],
            out_specs=[
                pl.BlockSpec((mode_block, b_pad, cout_p), lambda i: (i, 0, 0)),
                pl.BlockSpec((mode_block, b_pad, cout_p), lambda i: (i, 0, 0)),
            ],
        ),
        compiler_params=pltpu.CompilerParams(
            dimension_semantics=("parallel",),
            vmem_limit_bytes=vmem_limit,
        ),
    )(xr, xi, w_fused)


class SpectralConv1d:
    """JAX/Pallas port of the PyTorch SpectralConv1d module."""

    def __init__(self, in_channels, out_channels, modes1, key,
                 param_dtype=jnp.bfloat16, compute_dtype=jnp.bfloat16):
        self.in_channels = in_channels
        self.out_channels = out_channels
        self.modes1 = modes1
        self._param_dtype = param_dtype
        self._compute_dtype = compute_dtype

        scale = 1.0 / (in_channels * out_channels)
        kr, ki = jax.random.split(key)
        # Matches scale * torch.rand(in, out, modes, dtype=cfloat):
        # uniform [0,1) for both real and imaginary parts, then scaled.
        self.w_real = scale * jax.random.uniform(
            kr, (in_channels, out_channels, modes1), dtype=jnp.float32)
        self.w_imag = scale * jax.random.uniform(
            ki, (in_channels, out_channels, modes1), dtype=jnp.float32)

        # Channel padding: lane-dense (multiples of 128) K and N dims.
        self._cin_p = _round_up(in_channels, 128)
        self._cout_p = _round_up(out_channels, 128)

        # Mode-block sizing by VMEM budget: target ~2 MiB of streamed weight
        # tile per grid step (amortizes the ~0.35 us per-step overhead and keeps
        # the DMA engines busy), keep >= 2 grid steps when modes allow, and keep
        # the grid length even so v7x's two TensorCores split it evenly.
        w_bytes_per_mode = self._cin_p * 2 * self._cout_p * jnp.dtype(param_dtype).itemsize
        budget = 2 << 20
        mb = max(1, min(modes1, budget // w_bytes_per_mode))
        if modes1 >= 2:
            mb = max(1, min(mb, modes1 // 2))
        self.mode_block = int(mb)
        self._modes_pad = _round_up(modes1, 2 * self.mode_block)

        # --- Precompute padded, de-duplicated weights (once, not per call). ---
        wr = jnp.transpose(self.w_real, (2, 0, 1))   # (modes, Cin, Cout)
        wi = jnp.transpose(self.w_imag, (2, 0, 1))
        pad = ((0, self._modes_pad - modes1),
               (0, self._cin_p - in_channels),
               (0, self._cout_p - out_channels))
        wr = jnp.pad(wr, pad)
        wi = jnp.pad(wi, pad)
        # (modes_pad, Cin_p, 2*Cout_p): [Wr | Wi] on lanes, half the bytes of
        # the fully fused [[Wr,Wi],[-Wi,Wr]] block form.
        self.w_fused = jnp.concatenate([wr, wi], axis=-1).astype(param_dtype)

    def __call__(self, x):
        # x: (B, C_in, N) float32
        B, Cin, N = x.shape
        K = N // 2 + 1
        m = self.modes1

        # FFT along last axis (plain JAX; no Pallas FFT primitive).
        x_ft = jnp.fft.rfft(x, axis=-1)                  # (B, Cin, K) complex64
        xt = jnp.transpose(x_ft[:, :, :m], (2, 0, 1))    # (modes, B, Cin)

        # bf16 activations -> batch padded to 16 (bf16 sublane tile is (16,128)).
        b_pad = _round_up(B, 16)
        pad = ((0, self._modes_pad - m),
               (0, b_pad - B),
               (0, self._cin_p - Cin))
        xr = jnp.pad(jnp.real(xt), pad).astype(self._compute_dtype)
        xi = jnp.pad(jnp.imag(xt), pad).astype(self._compute_dtype)

        out_re, out_im = spectral_mul(xr, xi, self.w_fused, self.mode_block)

        re = jnp.transpose(out_re[:m, :B, :self.out_channels], (1, 2, 0))
        im = jnp.transpose(out_im[:m, :B, :self.out_channels], (1, 2, 0))
        out_ft_m = jax.lax.complex(re, im)               # (B, Cout, modes)

        # Single pad back to K modes (instead of zeros + at[].set).
        out_ft = jnp.pad(out_ft_m, ((0, 0), (0, 0), (0, K - m)))

        # Inverse FFT back to signal length N.
        return jnp.fft.irfft(out_ft, n=N, axis=-1)       # (B, Cout, N) float32


if __name__ == "__main__":
    key = jax.random.PRNGKey(0)
    k_w, k_x = jax.random.split(key)

    B, Cin, Cout, N, modes1 = 2, 4, 4, 16, 4

    layer = SpectralConv1d(Cin, Cout, modes1, key=k_w)
    x = jax.random.normal(k_x, (B, Cin, N), dtype=jnp.float32)

    fwd = jax.jit(layer.__call__)   # fuse the wrapper-side layout ops
    y = fwd(x)
    jax.block_until_ready(y)

    # Sanity check against a pure-JAX f32 reference of the same math.
    x_ft = jnp.fft.rfft(x, axis=-1)[:, :, :modes1]
    w = (layer.w_real + 1j * layer.w_imag).astype(jnp.complex64)
    out_ft_ref = jnp.einsum('bix,iox->box', x_ft, w)
    out_ft_full = jnp.zeros((B, Cout, N // 2 + 1), dtype=jnp.complex64)
    out_ft_full = out_ft_full.at[:, :, :modes1].set(out_ft_ref)
    y_ref = jnp.fft.irfft(out_ft_full, n=N, axis=-1)

    assert y.shape == (B, Cout, N)
    err = float(jnp.max(jnp.abs(y - y_ref)))
    # bf16 weights/activations (f32 accumulation) vs f32 reference.
    assert err < 1e-2, f"max abs err {err}"

    print("KERNEL_OK")
</pallas_src>

<mosaic_0001>
module attributes {stable_mosaic.version = 11 : i64} {
  func.func @_spectral_kernel(%arg0: i32, %arg1: memref<2x16x128xbf16, #tpu.memory_space<vmem>>, %arg2: memref<2x16x128xbf16, #tpu.memory_space<vmem>>, %arg3: memref<2x128x256xbf16, #tpu.memory_space<vmem>>, %arg4: memref<2x16x128xf32, #tpu.memory_space<vmem>>, %arg5: memref<2x16x128xf32, #tpu.memory_space<vmem>>) attributes {dimension_semantics = [#tpu.dimension_semantics<parallel>], iteration_bounds = array<i64: 2>, scalar_prefetch = 0 : i64, scratch_operands = 0 : i64, tpu.core_type = #tpu.core_type<tc>, window_params = [{transform_indices = @transform_0, window_bounds = array<i64: 2, 16, 128>}, {transform_indices = @transform_1, window_bounds = array<i64: 2, 16, 128>}, {transform_indices = @transform_2, window_bounds = array<i64: 2, 128, 256>}, {transform_indices = @transform_3, window_bounds = array<i64: 2, 16, 128>}, {transform_indices = @transform_4, window_bounds = array<i64: 2, 16, 128>}]} {
    %c0 = arith.constant 0 : index
    %c0_0 = arith.constant 0 : index
    %c0_1 = arith.constant 0 : index
    %0 = vector.load %arg1[%c0, %c0_0, %c0_1] : memref<2x16x128xbf16, #tpu.memory_space<vmem>>, vector<2x16x128xbf16>
    %c0_2 = arith.constant 0 : index
    %c0_3 = arith.constant 0 : index
    %c0_4 = arith.constant 0 : index
    %1 = vector.load %arg3[%c0_2, %c0_3, %c0_4] : memref<2x128x256xbf16, #tpu.memory_space<vmem>>, vector<2x128x256xbf16>
    "tpu.trace_start"() <{level = 10 : i32, message = "mbc,mcd->mbd"}> : () -> ()
    %cst = arith.constant dense<0.000000e+00> : vector<2x16x256xf32>
    %2 = tpu.matmul %0, %1, %cst {dimension_numbers = #tpu.dot_dimension_numbers<[2], [1], [1], [2], [0, 0, 0, 1, 1, 2], [0], [0]>} : vector<2x16x128xbf16>, vector<2x128x256xbf16>, vector<2x16x256xf32> -> vector<2x16x256xf32>
    "tpu.trace_stop"() : () -> ()
    %c0_5 = arith.constant 0 : index
    %c0_6 = arith.constant 0 : index
    %c0_7 = arith.constant 0 : index
    %3 = vector.load %arg2[%c0_5, %c0_6, %c0_7] : memref<2x16x128xbf16, #tpu.memory_space<vmem>>, vector<2x16x128xbf16>
    %c0_8 = arith.constant 0 : index
    %c0_9 = arith.constant 0 : index
    %c0_10 = arith.constant 0 : index
    %4 = vector.load %arg3[%c0_8, %c0_9, %c0_10] : memref<2x128x256xbf16, #tpu.memory_space<vmem>>, vector<2x128x256xbf16>
    "tpu.trace_start"() <{level = 10 : i32, message = "mbc,mcd->mbd"}> : () -> ()
    %cst_11 = arith.constant dense<0.000000e+00> : vector<2x16x256xf32>
    %5 = tpu.matmul %3, %4, %cst_11 {dimension_numbers = #tpu.dot_dimension_numbers<[2], [1], [1], [2], [0, 0, 0, 1, 1, 2], [0], [0]>} : vector<2x16x128xbf16>, vector<2x128x256xbf16>, vector<2x16x256xf32> -> vector<2x16x256xf32>
    "tpu.trace_stop"() : () -> ()
    %6 = vector.extract_strided_slice %2 {offsets = [0, 0, 0], sizes = [2, 16, 128], strides = [1, 1, 1]} : vector<2x16x256xf32> to vector<2x16x128xf32>
    %7 = vector.extract_strided_slice %5 {offsets = [0, 0, 128], sizes = [2, 16, 128], strides = [1, 1, 1]} : vector<2x16x256xf32> to vector<2x16x128xf32>
    %8 = arith.subf %6, %7 : vector<2x16x128xf32>
    %c0_12 = arith.constant 0 : index
    %c0_13 = arith.constant 0 : index
    %c0_14 = arith.constant 0 : index
    %9 = vector.load %arg4[%c0_12, %c0_13, %c0_14] : memref<2x16x128xf32, #tpu.memory_space<vmem>>, vector<2x16x128xf32>
    tpu.vector_store %arg4[%c0_12, %c0_13, %c0_14], %8 {strides = array<i32>} : memref<2x16x128xf32, #tpu.memory_space<vmem>>, vector<2x16x128xf32>,
    %10 = vector.extract_strided_slice %2 {offsets = [0, 0, 128], sizes = [2, 16, 128], strides = [1, 1, 1]} : vector<2x16x256xf32> to vector<2x16x128xf32>
    %11 = vector.extract_strided_slice %5 {offsets = [0, 0, 0], sizes = [2, 16, 128], strides = [1, 1, 1]} : vector<2x16x256xf32> to vector<2x16x128xf32>
    %12 = arith.addf %10, %11 : vector<2x16x128xf32>
    %c0_15 = arith.constant 0 : index
    %c0_16 = arith.constant 0 : index
    %c0_17 = arith.constant 0 : index
    %13 = vector.load %arg5[%c0_15, %c0_16, %c0_17] : memref<2x16x128xf32, #tpu.memory_space<vmem>>, vector<2x16x128xf32>
    tpu.vector_store %arg5[%c0_15, %c0_16, %c0_17], %12 {strides = array<i32>} : memref<2x16x128xf32, #tpu.memory_space<vmem>>, vector<2x16x128xf32>,
    return
  }
  func.func @transform_0(%arg0: i32) -> (i32, i32, i32) {
    %c0_i32 = arith.constant 0 : i32
    %c0_i32_0 = arith.constant 0 : i32
    %c0_i32_1 = arith.constant 0 : i32
    return %arg0, %c0_i32, %c0_i32_0 : i32, i32, i32
  }
  func.func @transform_1(%arg0: i32) -> (i32, i32, i32) {
    %c0_i32 = arith.constant 0 : i32
    %c0_i32_0 = arith.constant 0 : i32
    %c0_i32_1 = arith.constant 0 : i32
    return %arg0, %c0_i32, %c0_i32_0 : i32, i32, i32
  }
  func.func @transform_2(%arg0: i32) -> (i32, i32, i32) {
    %c0_i32 = arith.constant 0 : i32
    %c0_i32_0 = arith.constant 0 : i32
    %c0_i32_1 = arith.constant 0 : i32
    return %arg0, %c0_i32, %c0_i32_0 : i32, i32, i32
  }
  func.func @transform_3(%arg0: i32) -> (i32, i32, i32) {
    %c0_i32 = arith.constant 0 : i32
    %c0_i32_0 = arith.constant 0 : i32
    %c0_i32_1 = arith.constant 0 : i32
    return %arg0, %c0_i32, %c0_i32_0 : i32, i32, i32
  }
  func.func @transform_4(%arg0: i32) -> (i32, i32, i32) {
    %c0_i32 = arith.constant 0 : i32
    %c0_i32_0 = arith.constant 0 : i32
    %c0_i32_1 = arith.constant 0 : i32
    return %arg0, %c0_i32, %c0_i32_0 : i32, i32, i32
  }
}

</mosaic_0001>

<bundles_post_ra>
// kernel: reverse.1
= control target key start
LH: loop header
LB: loop body
LE: loop exit
PB: predicated region body
PF: predicated region fallthrough
CT: control target
= control target key end

     0   :  { %s92_s0 = inlined_call_operand.vmem [shape: f32[2,4,7], index: 0, kind: input, shape index: {}]   ;;  %s93_s1 = inlined_call_operand.vmem [shape: f32[2,4,7], index: 1, kind: output, shape index: {}]  }
   0x1   :  { %v28_v0 = vld [vmem:[%s92_s0 + $0xc] sm:$0x3]  ;;  %v29_v1 = vld [vmem:[%s92_s0 + $0xa] sm:$0x3]  ;;  %v31_v2 = vld [vmem:[%s92_s0 + $0x8] sm:$0x3] }
   0x2   :  { %4 = vst [vmem:[%s93_s1] sm:$0x3] %v28_v0  ;;  %30 = vst [vmem:[%s93_s1 + $0x2] sm:$0x3] %v29_v1  ;;  %v33_v3 = vld [vmem:[%s92_s0 + $0x6] sm:$0x3] }
   0x3   :  { %32 = vst [vmem:[%s93_s1 + $0x4] sm:$0x3] %v31_v2  ;;  %v35_v4 = vld [vmem:[%s92_s0 + $0x4] sm:$0x3]  ;;  %v37_v5 = vld [vmem:[%s92_s0 + $0x2] sm:$0x3] }
   0x4   :  { %34 = vst [vmem:[%s93_s1 + $0x6] sm:$0x3] %v33_v3  ;;  %36 = vst [vmem:[%s93_s1 + $0x8] sm:$0x3] %v35_v4  ;;  %v25_v6 = vld [vmem:[%s92_s0] sm:$0x3] }
   0x5   :  { %38 = vst [vmem:[%s93_s1 + $0xa] sm:$0x3] %v37_v5  ;;  %39 = vst [vmem:[%s93_s1 + $0xc] sm:$0x3] %v25_v6 }

// kernel: a_call__.1
= control target key start
LH: loop header
LB: loop body
LE: loop exit
PB: predicated region body
PF: predicated region fallthrough
CT: control target
= control target key end

     0   :  { %s1185_s15 = smov 0   ;;  %s1310_s0 = inlined_call_operand.vmem [shape: bf16[4,16,128], index: 0, kind: input, shape index: {}]   ;;  %s1311_s1 = inlined_call_operand.vmem [shape: bf16[4,16,128], index: 1, kind: input, shape index: {}]   ;;  %s1312_s2 = inlined_call_operand.vmem [shape: bf16[4,128,256], index: 2, kind: input, shape index: {}]   ;;  %s1313_s3 = inlined_call_operand.vmem [shape: f32[4,16,128], index: 3, kind: output, shape index: {0}]   ;;  %s1314_s4 = inlined_call_operand.vmem [shape: f32[4,16,128], index: 4, kind: output, shape index: {1}]  }
   0x1 LB: > { %s995_s16 = sadd.s32 4294967295, %s1157_s15   ;;  %p999_p0 = scmp.ge.s32.totalorder %s1157_s15, 1  ;;  %s1157_s15 = sphi %s1185_s15, %s15_s15  }
   0x2   : > { %p191_p1 = scmp.lt.s32.totalorder %s1157_s15, 3 }
   0x4   : > { %p192_p2 = pnand %p999_p0, %p191_p1 }
   0x5   : > { %s1000_s17 = sshll.u32 (!%p192_p2), %s995_s16, 1  ;;  %v1159_v0 = vmov (!%p192_p2), 0  }
   0x6   : > { %195 = sbr.rel (%p192_p2) target bundleno = 300 (0x12c), region = 32  ;;  %p238_p3 = scmp.lt.s32.totalorder (!%p192_p2), %s1000_s17, 3  ;;  %427 = vmatprep.mubr.bf16.mxu0 (!%p192_p2), %v1159_v0  ;;  %556 = vmatprep.mubr.bf16.mxu1 (!%p192_p2), %v1159_v0 }
   0xd   : > { %s1316_s17 = smov (!%p238_p3, %s1000_s17), 3 }
   0xe   : > { %s1087_s18 = sshll.u32 %s1316_s17, 7  ;;  %s1085_s22 = sshll.u32 %s1316_s17, 3 }
   0xf   : > { %s1201_s21 = scalar_lea.vmem %s1312_s2, %s1087_s18  ;;  %s242_s25 = scalar_lea.vmem %s1310_s0, %s1085_s22 }
  0x10   : > { %v1204_v1 = vld [vmem:[%s1201_s21 + $0x4] ss:$8 sps:$4 sm:$0xff]   ;;  %v1211_v3 = vld [vmem:[%s1201_s21] ss:$8 sps:$4 sm:$0xff]   ;;  %v1218_v5 = vld [vmem:[%s1201_s21 + $0x14] ss:$8 sps:$4 sm:$0xff]   ;;  %s1275_s28 = scalar_lea.vmem %s1311_s1, %s1085_s22 }
  0x11   : > { %v1207_v2 = vld [vmem:[%s1201_s21 + $0x84] ss:$8 sps:$4 sm:$0xff]   ;;  %395 = vmatprep.subr.bf16.mxu0 %v1204_v1  ;;  %v1214_v4 = vld [vmem:[%s1201_s21 + $0x80] ss:$8 sps:$4 sm:$0xff]   ;;  %v1223_v6 = vld [vmem:[%s1201_s21 + $0x94] ss:$8 sps:$4 sm:$0xff]  }
  0x12   : > { %524 = vmatprep.subr.bf16.mxu1 %v1207_v2  ;;  %396 = vmatpush1.bf16.msra.mxu0 %v1211_v3  ;;  %v1226_v7 = vld [vmem:[%s1201_s21 + $0x10] ss:$8 sps:$4 sm:$0xff]   ;;  %v1234_v9 = vld [vmem:[%s1201_s21 + $0x24] ss:$8 sps:$4 sm:$0xff]   ;;  %v1240_v11 = vld [vmem:[%s1201_s21 + $0x20] ss:$8 sps:$4 sm:$0xff]  }
  0x13   : > { %525 = vmatpush1.bf16.msra.mxu1 %v1214_v4  ;;  %397 = vmatprep.subr.bf16.mxu0 %v1218_v5  ;;  %v1230_v8 = vld [vmem:[%s1201_s21 + $0x90] ss:$8 sps:$4 sm:$0xff]   ;;  %v1237_v10 = vld [vmem:[%s1201_s21 + $0xa4] ss:$8 sps:$4 sm:$0xff]   ;;  %v1243_v12 = vld [vmem:[%s1201_s21 + $0xa0] ss:$8 sps:$4 sm:$0xff]  }
  0x14   : > { %526 = vmatprep.subr.bf16.mxu1 %v1223_v6  ;;  %v1248_v13 = vld [vmem:[%s1201_s21 + $0x34] ss:$8 sps:$4 sm:$0xff]   ;;  %v1121_v15 = vld [vmem:[%s1201_s21 + $0x30] ss:$8 sps:$4 sm:$0xff]   ;;  %v1123_v17 = vld [vmem:[%s1201_s21 + $0x44] ss:$8 sps:$4 sm:$0xff]  }
  0x15   : > { %v1119_v14 = vld [vmem:[%s1201_s21 + $0xb4] ss:$8 sps:$4 sm:$0xff]   ;;  %v1122_v16 = vld [vmem:[%s1201_s21 + $0xb0] ss:$8 sps:$4 sm:$0xff]   ;;  %v1125_v18 = vld [vmem:[%s1201_s21 + $0xc4] ss:$8 sps:$4 sm:$0xff]  }
  0x16   : > { %398 = vmatpush1.bf16.msra.mxu0 %v1226_v7  ;;  %v1127_v19 = vld [vmem:[%s1201_s21 + $0x40] ss:$8 sps:$4 sm:$0xff]   ;;  %v1129_v21 = vld [vmem:[%s1201_s21 + $0x54] ss:$8 sps:$4 sm:$0xff]   ;;  %v1133_v23 = vld [vmem:[%s1201_s21 + $0x50] ss:$8 sps:$4 sm:$0xff]  }
  0x17   : > { %527 = vmatpush1.bf16.msra.mxu1 %v1230_v8  ;;  %399 = vmatprep.subr.bf16.mxu0 %v1234_v9  ;;  %v1128_v20 = vld [vmem:[%s1201_s21 + $0xc0] ss:$8 sps:$4 sm:$0xff]   ;;  %v1131_v22 = vld [vmem:[%s1201_s21 + $0xd4] ss:$8 sps:$4 sm:$0xff]   ;;  %v1134_v24 = vld [vmem:[%s1201_s21 + $0xd0] ss:$8 sps:$4 sm:$0xff]  }
  0x18   : > { %528 = vmatprep.subr.bf16.mxu1 %v1237_v10  ;;  %v1135_v25 = vld [vmem:[%s1201_s21 + $0x64] ss:$8 sps:$4 sm:$0xff]   ;;  %v1139_v27 = vld [vmem:[%s1201_s21 + $0x60] ss:$8 sps:$4 sm:$0xff]   ;;  %v1141_v29 = vld [vmem:[%s1201_s21 + $0x74] ss:$8 sps:$4 sm:$0xff]  }
  0x19   : > { %v1137_v26 = vld [vmem:[%s1201_s21 + $0xe4] ss:$8 sps:$4 sm:$0xff]   ;;  %v1140_v28 = vld [vmem:[%s1201_s21 + $0xe0] ss:$8 sps:$4 sm:$0xff]   ;;  %v1143_v30 = vld [vmem:[%s1201_s21 + $0xf4] ss:$8 sps:$4 sm:$0xff]  }
  0x1a   : > { %400 = vmatpush1.bf16.msra.mxu0 %v1240_v11  ;;  %v1145_v31 = vld [vmem:[%s1201_s21 + $0x70] ss:$8 sps:$4 sm:$0xff]   ;;  %v1147_v33 = vld [vmem:[%s242_s25] sm:$0xff]   ;;  %v1148_v34 = vld [vmem:[%s242_s25 + $0x8] sm:$0xff]   ;;  %s1088_s29 = sshll.u32 %s1316_s17, 4 }
  0x1b   : > { %529 = vmatpush1.bf16.msra.mxu1 %v1243_v12  ;;  %401 = vmatprep.subr.bf16.mxu0 %v1248_v13  ;;  %v1146_v32 = vld [vmem:[%s1201_s21 + $0xf0] ss:$8 sps:$4 sm:$0xff]   ;;  %v1149_v35 = vld [vmem:[%s1275_s28] sm:$0xff]   ;;  %v1150_v36 = vld [vmem:[%s1275_s28 + $0x8] sm:$0xff]   ;;  %s270_s6 = scalar_lea.vmem %s1314_s4, %s1088_s29  ;;  %s263_s9 = scalar_lea.vmem %s1313_s3, %s1088_s29 }
  0x1c   : > { %530 = vmatprep.subr.bf16.mxu1 %v1119_v14 }
  0x1e   : > { %402 = vmatpush1.bf16.msra.mxu0 %v1121_v15 }
  0x1f   : > { %531 = vmatpush1.bf16.msra.mxu1 %v1122_v16  ;;  %403 = vmatprep.subr.bf16.mxu0 %v1123_v17 }
  0x20   : > { %532 = vmatprep.subr.bf16.mxu1 %v1125_v18 }
  0x22   : > { %404 = vmatpush1.bf16.msra.mxu0 %v1127_v19 }
  0x23   : > { %533 = vmatpush1.bf16.msra.mxu1 %v1128_v20  ;;  %405 = vmatprep.subr.bf16.mxu0 %v1129_v21 }
  0x24   : > { %534 = vmatprep.subr.bf16.mxu1 %v1131_v22 }
  0x26   : > { %406 = vmatpush1.bf16.msra.mxu0 %v1133_v23 }
  0x27   : > { %535 = vmatpush1.bf16.msra.mxu1 %v1134_v24  ;;  %407 = vmatprep.subr.bf16.mxu0 %v1135_v25 }
  0x28   : > { %536 = vmatprep.subr.bf16.mxu1 %v1137_v26 }
  0x2a   : > { %408 = vmatpush1.bf16.msra.mxu0 %v1139_v27 }
  0x2b   : > { %537 = vmatpush1.bf16.msra.mxu1 %v1140_v28  ;;  %409 = vmatprep.subr.bf16.mxu0 %v1141_v29 }
  0x2c   : > { %538 = vmatprep.subr.bf16.mxu1 %v1143_v30 }
  0x2e   : > { %410 = vmatpush1.bf16.msra.mxu0 %v1145_v31 }
  0x2f   : > { %539 = vmatpush1.bf16.msra.mxu1 %v1146_v32  ;;  %689 = vmatprep.subr.bf16.mxu0 %v1204_v1 }
  0x30   : > { %818 = vmatprep.subr.bf16.mxu1 %v1207_v2 }
  0x31   : > { %428 = vmatmul.mubr.bf16.vlgmr.msra.gmra.mrb[0].mxu0 %v1147_v33 }
  0x32   : > { %557 = vmatmul.mubr.bf16.vlgmr.msra.gmra.mrb[0].mxu1 %v1148_v34  ;;  %690 = vmatpush1.bf16.msra.mxu0 %v1211_v3 }
  0x33   : > { %819 = vmatpush1.bf16.msra.mxu1 %v1214_v4  ;;  %691 = vmatprep.subr.bf16.mxu0 %v1218_v5 }
  0x34   : > { %820 = vmatprep.subr.bf16.mxu1 %v1223_v6  ;;  %721 = vmatprep.mubr.bf16.mxu0 %v1159_v0 }
  0x35   : > { %850 = vmatprep.mubr.bf16.mxu1 %v1159_v0 }
  0x36   : > { %692 = vmatpush1.bf16.msra.mxu0 %v1226_v7 }
  0x37   : > { %821 = vmatpush1.bf16.msra.mxu1 %v1230_v8  ;;  %693 = vmatprep.subr.bf16.mxu0 %v1234_v9 }
  0x38   : > { %822 = vmatprep.subr.bf16.mxu1 %v1237_v10 }
  0x3a   : > { %694 = vmatpush1.bf16.msra.mxu0 %v1240_v11 }
  0x3b   : > { %823 = vmatpush1.bf16.msra.mxu1 %v1243_v12  ;;  %695 = vmatprep.subr.bf16.mxu0 %v1248_v13 }
  0x3c   : > { %824 = vmatprep.subr.bf16.mxu1 %v1119_v14 }
  0x3e   : > { %696 = vmatpush1.bf16.msra.mxu0 %v1121_v15 }
  0x3f   : > { %825 = vmatpush1.bf16.msra.mxu1 %v1122_v16  ;;  %697 = vmatprep.subr.bf16.mxu0 %v1123_v17 }
  0x40   : > { %826 = vmatprep.subr.bf16.mxu1 %v1125_v18 }
  0x42   : > { %698 = vmatpush1.bf16.msra.mxu0 %v1127_v19 }
  0x43   : > { %827 = vmatpush1.bf16.msra.mxu1 %v1128_v20  ;;  %699 = vmatprep.subr.bf16.mxu0 %v1129_v21 }
  0x44   : > { %828 = vmatprep.subr.bf16.mxu1 %v1131_v22 }
  0x46   : > { %700 = vmatpush1.bf16.msra.mxu0 %v1133_v23 }
  0x47   : > { %829 = vmatpush1.bf16.msra.mxu1 %v1134_v24  ;;  %701 = vmatprep.subr.bf16.mxu0 %v1135_v25 }
  0x48   : > { %830 = vmatprep.subr.bf16.mxu1 %v1137_v26 }
  0x4a   : > { %702 = vmatpush1.bf16.msra.mxu0 %v1139_v27 }
  0x4b   : > { %831 = vmatpush1.bf16.msra.mxu1 %v1140_v28  ;;  %703 = vmatprep.subr.bf16.mxu0 %v1141_v29 }
  0x4c   : > { %832 = vmatprep.subr.bf16.mxu1 %v1143_v30 }
  0x4e   : > { %704 = vmatpush1.bf16.msra.mxu0 %v1145_v31 }
  0x4f   : > { %833 = vmatpush1.bf16.msra.mxu1 %v1146_v32 }
  0x51   : > { %722 = vmatmul.mubr.bf16.vlgmr.msra.gmra.mrb[4].mxu0 %v1149_v35 }
  0x52   : > { %851 = vmatmul.mubr.bf16.vlgmr.msra.gmra.mrb[4].mxu1 %v1150_v36 }
 0x104   : > { %v429_v37 = vpop.f32.mrb[0].mxu0 }
 0x105   : > { %v558_v38 = vpop.f32.mrb[0].mxu1  ;;  %v431_v39 = vpop.f32.mrb[1].mxu0 }
 0x106   : > { %v560_v40 = vpop.f32.mrb[1].mxu1  ;;  %v433_v41 = vpop.f32.mrb[2].mxu0 }
 0x107   : > { %v562_v42 = vpop.f32.mrb[2].mxu1  ;;  %v435_v43 = vpop.f32.mrb[3].mxu0 }
 0x108   : > { %v564_v44 = vpop.f32.mrb[3].mxu1 }
 0x124   : > { %v723_v45 = vpop.f32.mrb[4].mxu0 }
 0x125   : > { %v852_v46 = vpop.f32.mrb[4].mxu1  ;;  %v869_v47 = vadd.f32 %v723_v45, %v431_v39  ;;  %v725_v49 = vpop.f32.mrb[5].mxu0 }
 0x126   : > { %v871_v48 = vadd.f32 %v852_v46, %v560_v40  ;;  %v854_v50 = vpop.f32.mrb[5].mxu1  ;;  %v861_v51 = vsub.f32 %v429_v37, %v725_v49  ;;  %v727_v53 = vpop.f32.mrb[6].mxu0 }
 0x127   : > { %v863_v52 = vsub.f32 %v558_v38, %v854_v50  ;;  %v856_v54 = vpop.f32.mrb[6].mxu1  ;;  %873 = vst [vmem:[%s270_s6] sm:$0xff] %v869_v47  ;;  %v870_v55 = vadd.f32 %v727_v53, %v435_v43  ;;  %v729_v57 = vpop.f32.mrb[7].mxu0 }
 0x128   : > { %v872_v56 = vadd.f32 %v856_v54, %v564_v44  ;;  %v858_v58 = vpop.f32.mrb[7].mxu1  ;;  %875 = vst [vmem:[%s270_s6 + $0x10] sm:$0xff] %v871_v48  ;;  %865 = vst [vmem:[%s263_s9] sm:$0xff] %v861_v51  ;;  %v862_v59 = vsub.f32 %v433_v41, %v729_v57 }
 0x129   : > { %v864_v60 = vsub.f32 %v562_v42, %v858_v58  ;;  %867 = vst [vmem:[%s263_s9 + $0x10] sm:$0xff] %v863_v52  ;;  %874 = vst [vmem:[%s270_s6 + $0x8] sm:$0xff] %v870_v55 }
 0x12a   : > { %876 = vst [vmem:[%s270_s6 + $0x18] sm:$0xff] %v872_v56  ;;  %866 = vst [vmem:[%s263_s9 + $0x8] sm:$0xff] %v862_v59 }
 0x12b   : > { %868 = vst [vmem:[%s263_s9 + $0x18] sm:$0xff] %v864_v60 }
 0x12c PF: > { %s15_s15 = sadd.s32 1, %s1157_s15  }
 0x12d   : > { %p12_p4 = scmp.ge.s32.totalorder %s15_s15, 4  }
 0x12f   :  { %14 = sbr.rel (!%p12_p4) target bundleno = 1 (0x1), region = 80 }

</bundles_post_ra>
